<compile_context>
chip_gen: v7x
topology: tpu7x:2x2x1
jax: 0.10.0
libtpu: 0.0.40
codegen_flags: <defaults>
</compile_context>

<pallas_src>
import math
import functools

import jax
import jax.numpy as jnp
from jax import lax
from jax.experimental import pallas as pl
from jax.experimental.pallas import tpu as pltpu

# ----------------------------- config (small synthetic shapes) -----------------------------
B = 8        # batch
S = 16       # sequence length
V = 64       # vocab (synthetic)
D = 128      # backbone model dim (pooled token dim)
H = 128      # backbone.config.hidden_size == num_labels of the seq-cls head ("embedding" dim)
C = 128      # num_classes (ArcFace out_features)

ARC_S = 30.0
ARC_M = 0.5
EASY_MARGIN = False


# ----------------------------- Pallas kernel -----------------------------
def _eedi_kernel(pooled_ref, wbT_ref, bb_ref, waT_ref, labels_ref,
                 logits_ref, loss_ref, emb_ref,
                 *, s, cos_m, sin_m, th, mm, easy_margin):
    # ---- backbone classification head: emb = pooled @ WbT + bb   (B, H) ----
    # bf16 x bf16 on the MXU, f32 accumulation.
    emb_f32 = jnp.dot(pooled_ref[...], wbT_ref[...],
                      preferred_element_type=jnp.float32)
    emb_f32 = emb_f32 + bb_ref[...].astype(jnp.float32)
    emb_bf16 = emb_f32.astype(jnp.bfloat16)
    emb_ref[...] = emb_bf16

    # ---- ArcFace (training branch, metrics_learning=True), scaled-cosine form ----
    # raw = emb @ WaT  (B, C), bf16 MXU path
    raw = jnp.dot(emb_bf16, waT_ref[...], preferred_element_type=jnp.float32)

    eps = 1e-12  # F.normalize default eps; x / max(||x||, eps) == x * rsqrt(max(||x||^2, eps^2))
    eps_sq = eps * eps

    x_f32 = emb_bf16.astype(jnp.float32)                                   # what ArcFace consumes
    x_sq = jnp.sum(x_f32 * x_f32, axis=-1, keepdims=True)                  # (B, 1)
    inv_x = lax.rsqrt(jnp.maximum(x_sq, eps_sq))                           # (B, 1)   EUP

    w_f32 = waT_ref[...].astype(jnp.float32)                               # (H, C)
    w_sq = jnp.sum(w_f32 * w_f32, axis=0, keepdims=True)                   # (1, C)
    inv_w = lax.rsqrt(jnp.maximum(w_sq, eps_sq))                           # (1, C)   EUP

    cosine = raw * inv_x * inv_w                                           # (B, C)
    sine = jnp.sqrt(jnp.clip(1.0 - cosine * cosine, 0.0, 1.0))
    phi = cosine * cos_m - sine * sin_m
    if easy_margin:
        phi = jnp.where(cosine > 0.0, phi, cosine)
    else:
        phi = jnp.where(cosine > th, phi, cosine - mm)

    # in-kernel one-hot from int labels (no dense (B,C) one-hot DMA)
    b, c = cosine.shape
    cls_ids = lax.broadcasted_iota(jnp.int32, (b, c), 1)
    one_hot = labels_ref[...] == cls_ids                                   # (B, C) bool

    out = jnp.where(one_hot, phi, cosine) * s                              # (B, C) f32
    logits_ref[...] = out.astype(logits_ref.dtype)

    # ---- cross-entropy loss (hard one-hot targets, mean over batch) ----
    # loss = mean_b( logsumexp(out_b) - out_b[label_b] ), no logp materialization.
    m_row = jnp.max(out, axis=-1, keepdims=True)                           # (B, 1)
    lse = jnp.log(jnp.sum(jnp.exp(out - m_row), axis=-1, keepdims=True)) + m_row
    tgt = jnp.sum(jnp.where(one_hot, out, 0.0), axis=-1, keepdims=True)    # (B, 1)
    loss_ref[...] = jnp.sum(lse - tgt, axis=0, keepdims=True) * (1.0 / b)  # (1, 1)


def eedi_cls_v1_forward_train(pooled, wb, bb, wa, labels,
                              *, s=ARC_S, m=ARC_M, easy_margin=EASY_MARGIN):
    """Fused (backbone head -> ArcFace -> cross-entropy) Pallas call (single invocation)."""
    kernel = functools.partial(
        _eedi_kernel,
        s=float(s),
        cos_m=math.cos(m), sin_m=math.sin(m),
        th=math.cos(math.pi - m), mm=math.sin(math.pi - m) * m,
        easy_margin=easy_margin,
    )

    b, _ = pooled.shape
    h = wb.shape[0]
    c = wa.shape[0]

    # Layout plumbing outside the kernel: pre-transpose weights so both in-kernel
    # matmuls are plain (M,K)@(K,N) with no XLU transposes.
    wbT = jnp.transpose(wb)                       # (D, H) bf16
    waT = jnp.transpose(wa)                       # (H, C) bf16
    labels2d = labels.reshape(b, 1).astype(jnp.int32)

    vmem = lambda: pl.BlockSpec(memory_space=pltpu.MemorySpace.VMEM)

    logits, loss, emb = pl.pallas_call(
        kernel,
        out_shape=(
            jax.ShapeDtypeStruct((b, c), jnp.bfloat16),   # logits
            jax.ShapeDtypeStruct((1, 1), jnp.float32),    # cls_loss
            jax.ShapeDtypeStruct((b, h), jnp.bfloat16),   # embeddings
        ),
        in_specs=[vmem(), vmem(), vmem(), vmem(), vmem()],
        out_specs=(vmem(), vmem(), vmem()),
    )(pooled, wbT, bb, waT, labels2d)

    return {"cls_loss": loss[0, 0], "seq_loss": None, "outputs": None,
            "logits": logits, "embeddings": emb}


# ----------------------------- glue: synthetic backbone front-end -----------------------------
def backbone_pool(input_ids, attention_mask, emb_table):
    """Token embed + masked mean pool (plain-JAX glue; gather has no clean Pallas path here)."""
    tok = emb_table[input_ids]                                # (B, S, D)
    mask = attention_mask[..., None].astype(jnp.float32)      # (B, S, 1)
    summed = jnp.sum(tok * mask, axis=1)
    denom = jnp.maximum(jnp.sum(mask, axis=1), 1.0)
    return (summed / denom).astype(jnp.bfloat16)              # (B, D)


def xavier_uniform(key, shape):
    fan_out, fan_in = shape
    limit = math.sqrt(6.0 / (fan_in + fan_out))
    return jax.random.uniform(key, shape, jnp.float32, -limit, limit)


if __name__ == "__main__":
    key = jax.random.PRNGKey(0)
    k_ids, k_emb, k_wb, k_bb, k_wa, k_lbl = jax.random.split(key, 6)

    # deterministic synthetic inputs
    input_ids = jax.random.randint(k_ids, (B, S), 0, V, dtype=jnp.int32)
    attention_mask = jnp.ones((B, S), dtype=jnp.int32)
    labels = jax.random.randint(k_lbl, (B,), 0, C, dtype=jnp.int32)

    # deterministic synthetic parameters
    emb_table = 0.02 * jax.random.normal(k_emb, (V, D), jnp.float32)
    wb = xavier_uniform(k_wb, (H, D)).astype(jnp.bfloat16)            # backbone cls head
    bb = jnp.zeros((1, H), jnp.bfloat16)
    wa = xavier_uniform(k_wa, (C, H)).astype(jnp.bfloat16)            # ArcFace weight

    pooled = backbone_pool(input_ids, attention_mask, emb_table)

    out = eedi_cls_v1_forward_train(pooled, wb, bb, wa, labels)
    jax.block_until_ready(out["logits"])
    jax.block_until_ready(out["cls_loss"])
    jax.block_until_ready(out["embeddings"])

    assert out["logits"].shape == (B, C) and out["logits"].dtype == jnp.bfloat16
    assert out["embeddings"].shape == (B, H) and out["embeddings"].dtype == jnp.bfloat16
    assert jnp.isfinite(out["cls_loss"])
    print("KERNEL_OK")
</pallas_src>

<mosaic_0001>
module attributes {stable_mosaic.version = 11 : i64} {
  func.func @_eedi_kernel(%arg0: memref<8x128xbf16, #tpu.memory_space<vmem>>, %arg1: memref<128x128xbf16, #tpu.memory_space<vmem>>, %arg2: memref<1x128xbf16, #tpu.memory_space<vmem>>, %arg3: memref<128x128xbf16, #tpu.memory_space<vmem>>, %arg4: memref<8x1xi32, #tpu.memory_space<vmem>>, %arg5: memref<8x128xbf16, #tpu.memory_space<vmem>>, %arg6: memref<1x1xf32, #tpu.memory_space<vmem>>, %arg7: memref<8x128xbf16, #tpu.memory_space<vmem>>) attributes {dimension_semantics = [], scalar_prefetch = 0 : i64, scratch_operands = 0 : i64, tpu.core_type = #tpu.core_type<tc>} {
    %c0 = arith.constant 0 : index
    %c0_0 = arith.constant 0 : index
    %0 = vector.load %arg0[%c0, %c0_0] : memref<8x128xbf16, #tpu.memory_space<vmem>>, vector<8x128xbf16>
    %c0_1 = arith.constant 0 : index
    %c0_2 = arith.constant 0 : index
    %1 = vector.load %arg1[%c0_1, %c0_2] : memref<128x128xbf16, #tpu.memory_space<vmem>>, vector<128x128xbf16>
    %cst = arith.constant dense<0.000000e+00> : vector<8x128xf32>
    %2 = tpu.matmul %0, %1, %cst {dimension_numbers = #tpu.dot_dimension_numbers<[1], [0], [0], [1], [0, 0, 1, 1], [], []>} : vector<8x128xbf16>, vector<128x128xbf16>, vector<8x128xf32> -> vector<8x128xf32>
    %c0_3 = arith.constant 0 : index
    %c0_4 = arith.constant 0 : index
    %3 = vector.load %arg2[%c0_3, %c0_4] : memref<1x128xbf16, #tpu.memory_space<vmem>>, vector<1x128xbf16>
    %4 = arith.extf %3 : vector<1x128xbf16> to vector<1x128xf32>
    %5 = vector.broadcast %4 : vector<1x128xf32> to vector<8x128xf32>
    %6 = arith.addf %2, %5 : vector<8x128xf32>
    %7 = arith.truncf %6 : vector<8x128xf32> to vector<8x128xbf16>
    %c0_5 = arith.constant 0 : index
    %c0_6 = arith.constant 0 : index
    %8 = vector.load %arg7[%c0_5, %c0_6] : memref<8x128xbf16, #tpu.memory_space<vmem>>, vector<8x128xbf16>
    tpu.vector_store %arg7[%c0_5, %c0_6], %7 {strides = array<i32>} : memref<8x128xbf16, #tpu.memory_space<vmem>>, vector<8x128xbf16>,
    %c0_7 = arith.constant 0 : index
    %c0_8 = arith.constant 0 : index
    %9 = vector.load %arg3[%c0_7, %c0_8] : memref<128x128xbf16, #tpu.memory_space<vmem>>, vector<128x128xbf16>
    %cst_9 = arith.constant dense<0.000000e+00> : vector<8x128xf32>
    %10 = tpu.matmul %7, %9, %cst_9 {dimension_numbers = #tpu.dot_dimension_numbers<[1], [0], [0], [1], [0, 0, 1, 1], [], []>} : vector<8x128xbf16>, vector<128x128xbf16>, vector<8x128xf32> -> vector<8x128xf32>
    %11 = arith.extf %7 : vector<8x128xbf16> to vector<8x128xf32>
    %12 = arith.mulf %11, %11 : vector<8x128xf32>
    %cst_10 = arith.constant dense<0.000000e+00> : vector<8xf32>
    %13 = vector.multi_reduction <add>, %12, %cst_10 [1] : vector<8x128xf32> to vector<8xf32>
    %14 = vector.shape_cast %13 : vector<8xf32> to vector<8x1xf32>
    %cst_11 = arith.constant 1.000000e-24 : f32
    %15 = vector.broadcast %cst_11 : f32 to vector<8x1xf32>
    %16 = arith.maximumf %14, %15 : vector<8x1xf32>
    %17 = math.rsqrt %16 : vector<8x1xf32>
    %c0_12 = arith.constant 0 : index
    %c0_13 = arith.constant 0 : index
    %18 = vector.load %arg3[%c0_12, %c0_13] : memref<128x128xbf16, #tpu.memory_space<vmem>>, vector<128x128xbf16>
    %19 = arith.extf %18 : vector<128x128xbf16> to vector<128x128xf32>
    %20 = arith.mulf %19, %19 : vector<128x128xf32>
    %cst_14 = arith.constant dense<0.000000e+00> : vector<128xf32>
    %21 = vector.multi_reduction <add>, %20, %cst_14 [0] : vector<128x128xf32> to vector<128xf32>
    %22 = vector.shape_cast %21 : vector<128xf32> to vector<1x128xf32>
    %cst_15 = arith.constant 1.000000e-24 : f32
    %23 = vector.broadcast %cst_15 : f32 to vector<1x128xf32>
    %24 = arith.maximumf %22, %23 : vector<1x128xf32>
    %25 = math.rsqrt %24 : vector<1x128xf32>
    %26 = vector.broadcast %17 : vector<8x1xf32> to vector<8x128xf32>
    %27 = arith.mulf %10, %26 : vector<8x128xf32>
    %28 = vector.broadcast %25 : vector<1x128xf32> to vector<8x128xf32>
    %29 = arith.mulf %27, %28 : vector<8x128xf32>
    %30 = arith.mulf %29, %29 : vector<8x128xf32>
    %cst_16 = arith.constant 1.000000e+00 : f32
    %31 = vector.broadcast %cst_16 : f32 to vector<8x128xf32>
    %32 = arith.subf %31, %30 : vector<8x128xf32>
    %cst_17 = arith.constant 0.000000e+00 : f32
    %cst_18 = arith.constant 1.000000e+00 : f32
    %33 = vector.broadcast %cst_17 : f32 to vector<8x128xf32>
    %34 = arith.maximumf %33, %32 : vector<8x128xf32>
    %35 = vector.broadcast %cst_18 : f32 to vector<8x128xf32>
    %36 = arith.minimumf %35, %34 : vector<8x128xf32>
    %37 = math.sqrt %36 : vector<8x128xf32>
    %cst_19 = arith.constant 0.87758255 : f32
    %38 = vector.broadcast %cst_19 : f32 to vector<8x128xf32>
    %39 = arith.mulf %29, %38 : vector<8x128xf32>
    %cst_20 = arith.constant 0.47942555 : f32
    %40 = vector.broadcast %cst_20 : f32 to vector<8x128xf32>
    %41 = arith.mulf %37, %40 : vector<8x128xf32>
    %42 = arith.subf %39, %41 : vector<8x128xf32>
    %cst_21 = arith.constant -0.87758255 : f32
    %43 = vector.broadcast %cst_21 : f32 to vector<8x128xf32>
    %44 = arith.cmpf ogt, %29, %43 : vector<8x128xf32>
    %cst_22 = arith.constant 0.239712775 : f32
    %45 = vector.broadcast %cst_22 : f32 to vector<8x128xf32>
    %46 = arith.subf %29, %45 : vector<8x128xf32>
    %47 = arith.select %44, %42, %46 : vector<8x128xi1>, vector<8x128xf32>
    %48 = tpu.iota {dimensions = array<i32: 1>} : vector<8x128xi32>
    %c0_23 = arith.constant 0 : index
    %c0_24 = arith.constant 0 : index
    %49 = vector.load %arg4[%c0_23, %c0_24] : memref<8x1xi32, #tpu.memory_space<vmem>>, vector<8x1xi32>
    %50 = vector.broadcast %49 : vector<8x1xi32> to vector<8x128xi32>
    %51 = arith.cmpi eq, %50, %48 : vector<8x128xi32>
    %52 = arith.select %51, %47, %29 : vector<8x128xi1>, vector<8x128xf32>
    %cst_25 = arith.constant 3.000000e+01 : f32
    %53 = vector.broadcast %cst_25 : f32 to vector<8x128xf32>
    %54 = arith.mulf %52, %53 : vector<8x128xf32>
    %55 = arith.truncf %54 : vector<8x128xf32> to vector<8x128xbf16>
    %c0_26 = arith.constant 0 : index
    %c0_27 = arith.constant 0 : index
    %56 = vector.load %arg5[%c0_26, %c0_27] : memref<8x128xbf16, #tpu.memory_space<vmem>>, vector<8x128xbf16>
    tpu.vector_store %arg5[%c0_26, %c0_27], %55 {strides = array<i32>} : memref<8x128xbf16, #tpu.memory_space<vmem>>, vector<8x128xbf16>,
    %cst_28 = arith.constant dense<0xFF800000> : vector<8xf32>
    %57 = vector.multi_reduction <maximumf>, %54, %cst_28 [1] : vector<8x128xf32> to vector<8xf32>
    %58 = vector.shape_cast %57 : vector<8xf32> to vector<8x1xf32>
    %59 = vector.broadcast %58 : vector<8x1xf32> to vector<8x128xf32>
    %60 = arith.subf %54, %59 : vector<8x128xf32>
    %61 = math.exp %60 : vector<8x128xf32>
    %cst_29 = arith.constant dense<0.000000e+00> : vector<8xf32>
    %62 = vector.multi_reduction <add>, %61, %cst_29 [1] : vector<8x128xf32> to vector<8xf32>
    %63 = vector.shape_cast %62 : vector<8xf32> to vector<8x1xf32>
    %64 = math.log %63 : vector<8x1xf32>
    %65 = arith.addf %64, %58 : vector<8x1xf32>
    %cst_30 = arith.constant 0.000000e+00 : f32
    %66 = vector.broadcast %cst_30 : f32 to vector<8x128xf32>
    %67 = arith.select %51, %54, %66 : vector<8x128xi1>, vector<8x128xf32>
    %cst_31 = arith.constant dense<0.000000e+00> : vector<8xf32>
    %68 = vector.multi_reduction <add>, %67, %cst_31 [1] : vector<8x128xf32> to vector<8xf32>
    %69 = vector.shape_cast %68 : vector<8xf32> to vector<8x1xf32>
    %70 = arith.subf %65, %69 : vector<8x1xf32>
    %cst_32 = arith.constant dense<0.000000e+00> : vector<1xf32>
    %71 = vector.multi_reduction <add>, %70, %cst_32 [0] : vector<8x1xf32> to vector<1xf32>
    %72 = vector.shape_cast %71 : vector<1xf32> to vector<1x1xf32>
    %cst_33 = arith.constant 1.250000e-01 : f32
    %73 = vector.broadcast %cst_33 : f32 to vector<1x1xf32>
    %74 = arith.mulf %72, %73 : vector<1x1xf32>
    %c0_34 = arith.constant 0 : index
    %c0_35 = arith.constant 0 : index
    %75 = vector.load %arg6[%c0_34, %c0_35] : memref<1x1xf32, #tpu.memory_space<vmem>>, vector<1x1xf32>
    tpu.vector_store %arg6[%c0_34, %c0_35], %74 {strides = array<i32>} : memref<1x1xf32, #tpu.memory_space<vmem>>, vector<1x1xf32>,
    return
  }
}

</mosaic_0001>

<bundles_post_ra>
// kernel: tpu_custom_call.1
= control target key start
LH: loop header
LB: loop body
LE: loop exit
PB: predicated region body
PF: predicated region fallthrough
CT: control target
= control target key end

     0   :  { %13 = vsyncpa [#allocation3], 0  ;;  %s803_s0 = inlined_call_operand.vmem [shape: bf16[8,128], index: 0, kind: input, shape index: {}]   ;;  %s804_s1 = inlined_call_operand.hbm [shape: bf16[128,128], index: 1, kind: input, shape index: {}]   ;;  %s805_s2 = inlined_call_operand.vmem [shape: bf16[1,128], index: 2, kind: input, shape index: {}]   ;;  %s806_s3 = inlined_call_operand.hbm [shape: bf16[128,128], index: 3, kind: input, shape index: {}]   ;;  %s807_s4 = inlined_call_operand.vmem [shape: s32[8,1], index: 4, kind: input, shape index: {}]   ;;  %s808_s5 = inlined_call_operand.hbm [shape: bf16[8,128], index: 5, kind: output, shape index: {0}]   ;;  %s809_s6 = inlined_call_operand.hbm [shape: f32[1,1], index: 6, kind: output, shape index: {1}]   ;;  %s810_s7 = inlined_call_operand.hbm [shape: bf16[8,128], index: 7, kind: output, shape index: {2}]  }
   0x1   :  { %14 = vsyncpa [#allocation6], 0 }
   0x2   :  { %15 = vsyncpa [#allocation4], 0 }
   0x3   :  { %16 = vsyncpa [#allocation9], 0  ;;  %s666_s24 = smov [#allocation2]   ;;  %s548_s28 = scalar_lea.hbm %s804_s1, 1024 }
   0x4   :  { %s24_s25 = sshll.u32 %s666_s24, 4  ;;  %p549_p0 = scmp.ne.s32.totalorder %s804_s1, %s548_s28  ;;  %s25_s25 = int_to_ptr.vmem [resolvable:$true] %s24_s25 }
   0x5   :  { %p552_p1 = scmp.lt.u32.totalorder %s548_s28, %s804_s1 }
   0x7   :  { %p554_p2 = pnand %p552_p1, %p549_p0 }
   0x9   :  { %557 = shalt.err (!%p554_p2)
}
   0xa   :  { %s558_s10 = scalar_lea.vmem %s25_s25, 1024  ;;  %p563_p4 = scmp.lt.s32.totalorder %s25_s25, %s25_s25 }
   0xb   :  { %p559_p3 = scmp.ne.s32.totalorder %s25_s25, %s558_s10  ;;  %p564_p5 = scmp.lt.s32.totalorder %s558_s10, %s558_s10 }
   0xd   :  { %p565_p6 = por %p564_p5, %p563_p4 }
   0xf   :  { %p566_p7 = pnand %p565_p6, %p559_p3 }
  0x11   :  { %569 = shalt.err (!%p566_p7)
}
  0x12   :  { %s667_s11 = smov 64   ;;  %s668_s12 = smov 4  }
  0x13   :  { %30 = dma.hbm_to_vmem [thread:$0]  %s804_s1, 1024, %s25_s25, [#allocation3], %s667_s11, %s667_s11, %s668_s12  }
  0x14   :  { %s669_s15 = smov [#allocation5]   ;;  %s570_s19 = scalar_lea.hbm %s806_s3, 1024 }
  0x15   :  { %s38_s16 = sshll.u32 %s669_s15, 4  ;;  %p571_p8 = scmp.ne.s32.totalorder %s806_s3, %s570_s19  ;;  %s39_s16 = int_to_ptr.vmem [resolvable:$true] %s38_s16 }
  0x16   :  { %p574_p9 = scmp.lt.u32.totalorder %s570_s19, %s806_s3 }
  0x18   :  { %p576_p10 = pnand %p574_p9, %p571_p8 }
  0x1a   :  { %579 = shalt.err (!%p576_p10)
}
  0x1b   :  { %s580_s24 = scalar_lea.vmem %s39_s16, 1024  ;;  %p585_p12 = scmp.lt.s32.totalorder %s39_s16, %s39_s16 }
  0x1c   :  { %p581_p11 = scmp.ne.s32.totalorder %s39_s16, %s580_s24  ;;  %p586_p13 = scmp.lt.s32.totalorder %s580_s24, %s580_s24 }
  0x1e   :  { %p587_p0 = por %p586_p13, %p585_p12 }
  0x20   :  { %p588_p1 = pnand %p587_p0, %p581_p11 }
  0x22   :  { %591 = shalt.err (!%p588_p1)
}
  0x23   :  { %44 = dma.hbm_to_vmem [thread:$0]  %s806_s3, 1024, %s39_s16, [#allocation6], %s667_s11, %s667_s11, %s668_s12  }
  0x24   :  { %658 = dma.done.wait [#allocation3], 1024  }
  0x25   :  { %659 = vsyncadd [#allocation3], 4294966272 }
  0x26   :  { %660 = dma.done.wait [#allocation6], 1024  }
  0x27   :  { %661 = vsyncadd [#allocation6], 4294966272  ;;  %v670_v0 = vmov 0.0   ;;  %vm671_vm0 = vmmov 0   ;;  %v514_v1 = vld [vmem:[#allocation2] sm:$0xff]   ;;  %v515_v2 = vld [vmem:[#allocation2 + $0x8] sm:$0xff]  }
  0x28   :  { %463 = vmatprep.subr.bf16.mxu0 %v670_v0  ;;  %479 = vmatprep.mubr.msk.bf16.mxu0 %vm671_vm0, %v670_v0  ;;  %v516_v3 = vld [vmem:[#allocation2 + $0x10] sm:$0xff]   ;;  %v167_v4 = vld [vmem:[#allocation5] sm:$0xff]   ;;  %v169_v5 = vld [vmem:[#allocation5 + $0x8] sm:$0xff]  }
  0x29   :  { %483 = vmatprep.subr.bf16.mxu1 %v670_v0  ;;  %499 = vmatprep.mubr.msk.bf16.mxu1 %vm671_vm0, %v670_v0  ;;  %v277_v6 = vunpack.c.l.bf16 %v167_v4  ;;  %v278_v7 = vunpack.c.h.bf16 %v167_v4  ;;  %v517_v8 = vld [vmem:[#allocation2 + $0x18] sm:$0xff]   ;;  %v279_v9 = vunpack.c.l.bf16 %v169_v5  ;;  %v280_v10 = vunpack.c.h.bf16 %v169_v5  ;;  %v171_v11 = vld [vmem:[#allocation5 + $0x10] sm:$0xff]   ;;  %v518_v19 = vld [vmem:[#allocation2 + $0x20] sm:$0xff]  }
  0x2a   :  { %464 = vmatpush3.bf16.msra.mxu0 %v514_v1  ;;  %484 = vmatpush3.bf16.msra.mxu1 %v167_v4  ;;  %v281_v14 = vunpack.c.l.bf16 %v171_v11  ;;  %v282_v18 = vunpack.c.h.bf16 %v171_v11  ;;  %v173_v20 = vld [vmem:[#allocation5 + $0x18] sm:$0xff]   ;;  %v519_v27 = vld [vmem:[#allocation2 + $0x28] sm:$0xff]   ;;  %v175_v28 = vld [vmem:[#allocation5 + $0x20] sm:$0xff]   ;;  %v672_v1 = vmov 0  }
  0x2b   :  { %465 = vmatprep.subr.bf16.mxu0 %v670_v0  ;;  %v293_v12 = vmul.f32 %v277_v6, %v277_v6  ;;  %v294_v13 = vmul.f32 %v278_v7, %v278_v7  ;;  %485 = vmatprep.subr.bf16.mxu1 %v670_v0  ;;  %v295_v15 = vmul.f32 %v279_v9, %v279_v9  ;;  %v283_v23 = vunpack.c.l.bf16 %v173_v20  ;;  %v520_v35 = vld [vmem:[#allocation2 + $0x30] sm:$0xff]   ;;  %v177_v36 = vld [vmem:[#allocation5 + $0x28] sm:$0xff]   ;;  %v521_v43 = vld [vmem:[#allocation2 + $0x38] sm:$0xff]  }
  0x2c   :  { %v296_v17 = vmul.f32 %v280_v10, %v280_v10  ;;  %v297_v22 = vmul.f32 %v281_v14, %v281_v14  ;;  %v298_v25 = vmul.f32 %v282_v18, %v282_v18  ;;  %v284_v26 = vunpack.c.h.bf16 %v173_v20  ;;  %v179_v44 = vld [vmem:[#allocation5 + $0x30] sm:$0xff]   ;;  %v54_v51 = vld [vmem:[%s803_s0] sm:$0xf]  ;;  %v181_v58 = vld [vmem:[#allocation5 + $0x38] sm:$0xff]   ;;  %513 = vset.pattern.permute.xlu0 %v672_v1 }
  0x2d   :  { %v309_v16 = vadd.f32 %v294_v13, %v293_v12  ;;  %v299_v30 = vmul.f32 %v283_v23, %v283_v23  ;;  %v285_v31 = vunpack.c.l.bf16 %v175_v28  ;;  %v286_v34 = vunpack.c.h.bf16 %v175_v28 }
  0x2e   :  { %466 = vmatpush3.bf16.msra.mxu0 %v515_v2  ;;  %486 = vmatpush3.bf16.msra.mxu1 %v169_v5  ;;  %v300_v33 = vmul.f32 %v284_v26, %v284_v26  ;;  %v287_v39 = vunpack.c.l.bf16 %v177_v36  ;;  %v288_v42 = vunpack.c.h.bf16 %v177_v36  ;;  %v289_v47 = vunpack.c.l.bf16 %v179_v44  ;;  %v71_v5 = vld [vmem:[%s805_s2] sm:$0x1]  ;;  %s673_s2 = smov [#allocation7]  }
  0x2f   :  { %467 = vmatprep.subr.bf16.mxu0 %v670_v0  ;;  %v310_v21 = vadd.f32 %v309_v16, %v295_v15  ;;  %487 = vmatprep.subr.bf16.mxu1 %v670_v0  ;;  %v301_v38 = vmul.f32 %v285_v31, %v285_v31  ;;  %v302_v41 = vmul.f32 %v286_v34, %v286_v34  ;;  %v290_v50 = vunpack.c.h.bf16 %v179_v44  ;;  %v353_v16 = vld [vmem:[%s807_s4] sm:$0xff]  ;;  %s391_s4 = sshll.u32 %s673_s2, 4  ;;  %s392_s4 = int_to_ptr.vmem [resolvable:$true] %s391_s4 }
  0x30   :  { %v303_v46 = vmul.f32 %v287_v39, %v287_v39  ;;  %v304_v49 = vmul.f32 %v288_v42, %v288_v42  ;;  %v305_v53 = vmul.f32 %v289_v47, %v289_v47  ;;  %v291_v59 = vunpack.c.l.bf16 %v181_v58  ;;  %s592_s30 = scalar_lea.vmem %s392_s4, 64  ;;  %p597_p3 = scmp.lt.s32.totalorder %s392_s4, %s392_s4 }
  0x31   :  { %v311_v24 = vadd.f32 %v310_v21, %v296_v17  ;;  %v306_v55 = vmul.f32 %v290_v50, %v290_v50  ;;  %v292_v60 = vunpack.c.h.bf16 %v181_v58  ;;  %v72_v6 = vunpack.c.l.bf16 %v71_v5  ;;  %p593_p2 = scmp.ne.s32.totalorder %s392_s4, %s592_s30  ;;  %p598_p4 = scmp.lt.s32.totalorder %s592_s30, %s592_s30 }
  0x32   :  { %468 = vmatpush3.bf16.msra.mxu0 %v516_v3  ;;  %488 = vmatpush3.bf16.msra.mxu1 %v171_v11  ;;  %v307_v61 = vmul.f32 %v291_v59, %v291_v59  ;;  %v73_v3 = vlaneseq }
  0x33   :  { %469 = vmatprep.subr.bf16.mxu0 %v670_v0  ;;  %v312_v29 = vadd.f32 %v311_v24, %v297_v22  ;;  %489 = vmatprep.subr.bf16.mxu1 %v670_v0  ;;  %v308_v62 = vmul.f32 %v292_v60, %v292_v60  ;;  %p599_p5 = por %p598_p4, %p597_p3 }
  0x34   :  { %v74_v4 = vshrl.u32 %v73_v3, 7 }
  0x35   :  { %v313_v32 = vadd.f32 %v312_v29, %v298_v25  ;;  %p600_p6 = pnand %p599_p5, %p593_p2 }
  0x36   :  { %470 = vmatpush3.bf16.msra.mxu0 %v517_v8  ;;  %490 = vmatpush3.bf16.msra.mxu1 %v173_v20  ;;  %v75_v7 = vsub.s32 0, %v74_v4 }
  0x37   :  { %471 = vmatprep.subr.bf16.mxu0 %v670_v0  ;;  %v314_v37 = vadd.f32 %v313_v32, %v299_v30  ;;  %491 = vmatprep.subr.bf16.mxu1 %v670_v0 }
  0x39   :  { %v315_v40 = vadd.f32 %v314_v37, %v300_v33 }
  0x3a   :  { %472 = vmatpush3.bf16.msra.mxu0 %v518_v19  ;;  %492 = vmatpush3.bf16.msra.mxu1 %v175_v28 }
  0x3b   :  { %473 = vmatprep.subr.bf16.mxu0 %v670_v0  ;;  %v316_v45 = vadd.f32 %v315_v40, %v301_v38  ;;  %493 = vmatprep.subr.bf16.mxu1 %v670_v0 }
  0x3d   :  { %v317_v48 = vadd.f32 %v316_v45, %v302_v41  ;;  %v352_v41 = vand.u32 127, %v73_v3 }
  0x3e   :  { %474 = vmatpush3.bf16.msra.mxu0 %v519_v27  ;;  %494 = vmatpush3.bf16.msra.mxu1 %v177_v36 }
  0x3f   :  { %475 = vmatprep.subr.bf16.mxu0 %v670_v0  ;;  %v318_v52 = vadd.f32 %v317_v48, %v303_v46  ;;  %495 = vmatprep.subr.bf16.mxu1 %v670_v0 }
  0x41   :  { %v319_v54 = vadd.f32 %v318_v52, %v304_v49 }
  0x42   :  { %476 = vmatpush3.bf16.msra.mxu0 %v520_v35  ;;  %496 = vmatpush3.bf16.msra.mxu1 %v179_v44 }
  0x43   :  { %477 = vmatprep.subr.bf16.mxu0 %v670_v0  ;;  %v320_v56 = vadd.f32 %v319_v54, %v305_v53  ;;  %497 = vmatprep.subr.bf16.mxu1 %v670_v0  ;;  %v76_v0 = vrot.slane %v72_v6, %v75_v7 }
  0x45   :  { %v321_v57 = vadd.f32 %v320_v56, %v306_v55 }
  0x46   :  { %478 = vmatpush3.bf16.msra.mxu0 %v521_v43  ;;  %498 = vmatpush3.bf16.msra.mxu1 %v181_v58 }
  0x47   :  { %v322_v63 = vadd.f32 %v321_v57, %v307_v61 }
  0x49   :  { %480 = vmatmul.mubr.bf16.vlgmr.msra.gmra.mrb[0].mxu0 %v54_v51  ;;  %v323_v2 = vadd.f32 %v322_v63, %v308_v62 }
  0x4b   :  { %v324_v17 = vrot.slane %v323_v2, 4 }
  0x4d   :  { %v325_v18 = vadd.f32 %v324_v17, %v323_v2 }
  0x4f   :  { %v326_v19 = vrot.slane %v325_v18, 2 }
  0x51   :  { %v327_v20 = vadd.f32 %v326_v19, %v325_v18 }
  0x53   :  { %v328_v21 = vrot.slane %v327_v20, 1 }
  0x55   :  { %v329_v22 = vadd.f32 %v328_v21, %v327_v20 }
  0x57   :  { %v330_v24 = vmax.f32 %v329_v22, 1e-24 }
  0x59   :  { %538 = vrsqrt.f32 %v330_v24 }
  0x63   :  { %v539_v26 = vpop.eup %538 }
 0x11c   :  { %v159_v8 = vpop.f32.mrb[0].mxu0 }
 0x11d   :  { %v160_v9 = vadd.f32 %v159_v8, %v76_v0  ;;  %v481_v10 = vpop.f32.mrb[1].mxu0 }
 0x11e   :  { %v162_v11 = vpop.f32.mrb[2].mxu0 }
 0x11f   :  { %v165_v12 = vpack.c.bf16 %v160_v9, %v160_v9  ;;  %v482_v13 = vpop.f32.mrb[3].mxu0 }
 0x121   :  { %166 = vst [vmem:[#allocation10] sm:$0xf] %v165_v12  ;;  %500 = vmatmul.mubr.bf16.vlgmr.msra.gmra.mrb[0].mxu1 %v165_v12  ;;  %v271_v14 = vunpack.c.l.bf16 %v165_v12 }
 0x123   :  { %v272_v15 = vmul.f32 %v271_v14, %v271_v14 }
 0x125   :  { %273 = vadd.xlane.f32.xlu0 %v272_v15 }
 0x13b   :  { %355 = vperm.xlu0 %513, %v353_v16  }
 0x1b2   :  { %v274_v23 = vpop.xlane.xlu0 %273 }
 0x1b3   :  { %v275_v25 = vmax.f32 %v274_v23, 1e-24 }
 0x1b5   :  { %540 = vrsqrt.f32 %v275_v25 }
 0x1ba   :  { %v356_v43 = vpop.permute.xlu0 %355 }
 0x1bb   :  { %vm357_vm3 = vcmp.eq.s32.totalorder %v356_v43, %v352_v41 }
 0x1bf   :  { %v541_v27 = vpop.eup %540 }
 0x1f4   :  { %v265_v28 = vpop.f32.mrb[0].mxu1 }
 0x1f5   :  { %v332_v29 = vmul.f32 %v541_v27, %v265_v28  ;;  %v501_v30 = vpop.f32.mrb[1].mxu1 }
 0x1f6   :  { %v268_v31 = vpop.f32.mrb[2].mxu1 }
 0x1f7   :  { %v333_v32 = vmul.f32 %v539_v26, %v332_v29  ;;  %v502_v33 = vpop.f32.mrb[3].mxu1 }
 0x1f9   :  { %v334_v34 = vmul.f32 %v333_v32, %v333_v32  ;;  %v345_v45 = vmul.f32 0.87758255, %v333_v32  ;;  %v444_v48 = vadd.f32 -0.23971277, %v333_v32  ;;  %vm348_vm4 = vcmp.gt.f32.partialorder %v333_v32, -0.87758255 }
 0x1fb   :  { %v335_v35 = vsub.f32 1.0, %v334_v34 }
 0x1fd   :  { %v336_v36 = vmax.f32 %v335_v35, 0.0 }
 0x1ff   :  { %v337_v37 = vmin.f32 %v336_v36, 1.0 }
 0x201   :  { %542 = vrsqrt.f32 %v337_v37  ;;  %vm340_vm1 = vcmp.eq.f32.partialorder %v337_v37, inf  ;;  %v343_v40 = vand.u32 2147483648, %v337_v37  ;;  %vm342_vm2 = vcmp.eq.f32.partialorder %v337_v37, 0.0 }
 0x20b   :  { %v543_v38 = vpop.eup %542 }
 0x20c   :  { %v339_v39 = vmul.f32 %v543_v38, %v337_v37 }
 0x20e   :  { %v341_v42 = vsel %vm340_vm1, %v337_v37, %v339_v39 }
 0x20f   :  { %v344_v44 = vsel %vm342_vm2, %v343_v40, %v341_v42 }
 0x210   :  { %v346_v46 = vmul.f32 0.47942555, %v344_v44 }
 0x212   :  { %v347_v47 = vsub.f32 %v345_v45, %v346_v46 }
 0x214   :  { %v350_v49 = vsel %vm348_vm4, %v347_v47, %v444_v48 }
 0x215   :  { %v358_v50 = vsel %vm357_vm3, %v350_v49, %v333_v32 }
 0x216   :  { %v359_v51 = vmul.f32 30.0, %v358_v50 }
 0x218   :  { %362 = vmax.xlane.f32.xlu1 %v359_v51  ;;  %v360_v52 = vpack.c.bf16 %v359_v51, %v359_v51  ;;  %v372_v57 = vsel %vm357_vm3, %v359_v51, 0.0 }
 0x21a   :  { %361 = vst [vmem:[#allocation7] sm:$0xf] %v360_v52 }
 0x2a5   :  { %v363_v53 = vpop.xlane.xlu1 %362 }
 0x2a6   :  { %v364_v54 = vsub.f32 %v359_v51, %v363_v53 }
 0x2a8   :  { %v365_v55 = vmul.f32 1.442695, %v364_v54 }
 0x2aa   :  { %544 = vpow2.f32 %v365_v55 }
 0x2b4   :  { %v545_v56 = vpop.eup %544 }
 0x2b5   :  { %367 = vadd.xlane.f32.xlu1 %v545_v56 }
 0x2b9   :  { %373 = vadd.xlane.f32.xlu1 %v372_v57 }
 0x2ba   :  { %603 = shalt.err (!%p600_p6)
}
 0x2bb   :  { %s604_s10 = scalar_lea.hbm %s808_s5, 64 }
 0x2bc   :  { %p605_p7 = scmp.ne.s32.totalorder %s808_s5, %s604_s10  ;;  %p608_p8 = scmp.lt.u32.totalorder %s604_s10, %s808_s5 }
 0x2be   :  { %p610_p9 = pnand %p608_p8, %p605_p7 }
 0x2c0   :  { %613 = shalt.err (!%p610_p9)
}
 0x2c1   :  { %394 = dma.vmem_to_hbm [thread:$0]  %s392_s4, 64, %s808_s5, [#allocation4]   ;;  %vm383_vm5 = vcmask 0  }
 0x2c2   :  { %s674_s17 = smov [#allocation8]   ;;  %s675_s19 = smov [#allocation10]  }
 0x2c3   :  { %s401_s18 = sshll.u32 %s674_s17, 4  ;;  %s411_s20 = sshll.u32 %s675_s19, 4  ;;  %s402_s18 = int_to_ptr.vmem [resolvable:$true] %s401_s18  ;;  %s412_s20 = int_to_ptr.vmem [resolvable:$true] %s411_s20 }
 0x2c4   :  { %s614_s5 = scalar_lea.vmem %s402_s18, 16  ;;  %s618_s21 = scalar_lea.vmem %s402_s18, 32 }
 0x2c5   :  { %p615_p10 = scmp.ne.s32.totalorder %s402_s18, %s614_s5  ;;  %p619_p11 = scmp.lt.s32.totalorder %s402_s18, %s402_s18 }
 0x2c6   :  { %p620_p12 = scmp.lt.s32.totalorder %s618_s21, %s614_s5 }
 0x2c8   :  { %p621_p13 = por %p620_p12, %p619_p11 }
 0x2ca   :  { %p622_p0 = pnand %p621_p13, %p615_p10 }
 0x342   :  { %v368_v58 = vpop.xlane.xlu1 %367 }
 0x343   :  { %546 = vlog2.f32 %v368_v58 }
 0x346   :  { %v374_v62 = vpop.xlane.xlu1 %373 }
 0x34d   :  { %v547_v59 = vpop.eup %546 }
 0x34e   :  { %v370_v60 = vmul.f32 0.6931472, %v547_v59 }
 0x350   :  { %v371_v61 = vadd.f32 %v370_v60, %v363_v53 }
 0x352   :  { %v375_v63 = vsub.f32 %v371_v61, %v374_v62 }
 0x354   :  { %v376_v1 = vrot.slane %v375_v63, 4 }
 0x356   :  { %v377_v2 = vadd.f32 %v376_v1, %v375_v63 }
 0x358   :  { %v378_v3 = vrot.slane %v377_v2, 2 }
 0x35a   :  { %v379_v4 = vadd.f32 %v378_v3, %v377_v2 }
 0x35c   :  { %v380_v5 = vrot.slane %v379_v4, 1 }
 0x35e   :  { %v381_v6 = vadd.f32 %v380_v5, %v379_v4 }
 0x360   :  { %v382_v7 = vmul.f32 0.125, %v381_v6 }
 0x362   :  { %384 = vst.msk [vmem:[#allocation8] sm:$0x1] %vm383_vm5, %v382_v7 }
 0x363   :  { %625 = shalt.err (!%p622_p0)
}
 0x364   :  { %s626_s24 = scalar_lea.hbm %s809_s6, 16 }
 0x365   :  { %p627_p1 = scmp.ne.s32.totalorder %s809_s6, %s626_s24  ;;  %p630_p2 = scmp.lt.u32.totalorder %s626_s24, %s809_s6 }
 0x367   :  { %p632_p3 = pnand %p630_p2, %p627_p1 }
 0x369   :  { %635 = shalt.err (!%p632_p3)
}
 0x36a   :  { %404 = dma.vmem_to_hbm [thread:$0]  %s402_s18, 16, %s809_s6, [#allocation9]  }
 0x36b   :  { %s636_s28 = scalar_lea.vmem %s412_s20, 64  ;;  %p641_p5 = scmp.lt.s32.totalorder %s412_s20, %s412_s20 }
 0x36c   :  { %p637_p4 = scmp.ne.s32.totalorder %s412_s20, %s636_s28  ;;  %p642_p6 = scmp.lt.s32.totalorder %s636_s28, %s636_s28 }
 0x36e   :  { %p643_p7 = por %p642_p6, %p641_p5 }
 0x370   :  { %p644_p8 = pnand %p643_p7, %p637_p4 }
 0x372   :  { %647 = shalt.err (!%p644_p8)
}
 0x373   :  { %s648_s4 = scalar_lea.hbm %s810_s7, 64 }
 0x374   :  { %p649_p9 = scmp.ne.s32.totalorder %s810_s7, %s648_s4  ;;  %p652_p10 = scmp.lt.u32.totalorder %s648_s4, %s810_s7 }
 0x376   :  { %p654_p11 = pnand %p652_p10, %p649_p9 }
 0x378   :  { %657 = shalt.err (!%p654_p11)
}
 0x379   :  { %414 = dma.vmem_to_hbm [thread:$0]  %s412_s20, 64, %s810_s7, [#allocation9]  }
 0x37a   :  { %662 = dma.done.wait [#allocation4], 64  }
 0x37b   :  { %663 = vsyncadd [#allocation4], 4294967232 }
 0x37c   :  { %664 = dma.done.wait [#allocation9], 80  }
 0x37d   :  { %665 = vsyncadd [#allocation9], 4294967216 }
 0x37e   :  { %424 = vsyncpa [#allocation3], 1 }
 0x37f   :  { %425 = vsyncpa [#allocation6], 1 }
 0x380   :  { %426 = vsyncpa [#allocation4], 1 }
 0x381   :  { %427 = vsyncpa [#allocation9], 1 }

</bundles_post_ra>
